<compile_context>
chip_gen: v6e
topology: v6e:2x2x1
jax: 0.10.0
libtpu: 0.0.40
codegen_flags: <defaults>
</compile_context>

<pallas_src>
from functools import partial

import numpy as np
import jax
import jax.numpy as jnp
from jax.experimental import pallas as pl
from jax.experimental.pallas import tpu as pltpu

# ------------------------- model hyper-parameters ---------------------------
B = 512                                   # batch used in the demo
FIELD_DIMS = np.array([8, 8, 8, 8], dtype=np.int32)
F = len(FIELD_DIMS)                       # num fields = 4
N_VOCAB = int(np.sum(FIELD_DIMS))         # 32
E = 16                                    # args.embed_dim
D = F * E                                 # embed_output_dim = 64
MLP_DIMS = (16,)                          # args.mlp_dims
H = MLP_DIMS[0]
L = 2                                     # args.num_layers
BN_EPS = 1e-5

# FM_DCN's `x_fm + x_out` silently requires embed_dim == mlp_dims[0].
assert E == H, "FM_DCN requires args.embed_dim == args.mlp_dims[0]"
assert len(MLP_DIMS) == 1, "kernel implements the single-layer MLP of this config"
assert L >= 1

# ---------------------- packed weight-slab layout ----------------------------
# One f32 slab, lanes = D (=64); every sub-block starts at an 8-aligned row so
# all in-kernel slices are layout-clean.
SLAB_C = D                                # vocab (padded) and D share the lane axis
assert N_VOCAB <= SLAB_C, "one-hot gather assumes sum(field_dims) <= embed_output_dim"
RG = D + 2 * E + 1                        # gather-table rows: x0-block | sum_e | sum_e2 | lin  (97)
RG_PAD = pl.cdiv(RG, 8) * 8               # 104
PROJ_R0 = RG_PAD                          # 104 : projection block [w_cross rows @ 8i ; W1_bn]
PROJ_ROWS = 8 * L + H                     # 32
B1_R0 = PROJ_R0 + PROJ_ROWS               # 136 : BN/cross-folded MLP bias column (H,1)
WCD_R = B1_R0 + H                         # 152 : cd_linear weight row (1,H)
SLAB_R = pl.cdiv(WCD_R + 1, 8) * 8        # 160


# ----------------------------- Pallas kernel ---------------------------------
def fm_dcn_kernel(idx_ref, slab_ref, scal_ref, out_ref):
    tb = out_ref.shape[-1]
    idx = idx_ref[...]                                             # (F, TB) int32 global indices

    # ---- fused embedding gather: build a (vocab_pad, TB) one-hot on the VPU,
    #      then ONE (RG_PAD, C) @ (C, TB) MXU matmul simultaneously gathers the
    #      flattened main embedding (block-placed rows), field-sums emb_fm and
    #      emb_fm^2, and gathers+field-sums the FeaturesLinear weights.
    iota_v = jax.lax.broadcasted_iota(jnp.int32, (SLAB_C, tb), 0)
    onehot = jnp.zeros((SLAB_C, tb), jnp.float32)
    for f in range(F):                     # fields map to disjoint vocab ranges
        onehot += (iota_v == idx[f:f + 1, :]).astype(jnp.float32)
    g = jnp.dot(slab_ref[0:RG_PAD, :], onehot,
                preferred_element_type=jnp.float32)                # (RG_PAD, TB)

    x0 = g[0:D]                            # (D, TB) flattened main embedding
    sum_e = g[D:D + E]                     # (E, TB) sum_f emb_fm
    sum_e2 = g[D + E:D + 2 * E]            # (E, TB) sum_f emb_fm^2
    lin = g[D + 2 * E:D + 2 * E + 1] + scal_ref[L]   # (1, TB) FeaturesLinear + bias

    # ---- FactorizationMachine (reduce_sum=False); lin broadcasts over embed dim
    ix = 0.5 * (sum_e * sum_e - sum_e2)
    x_fm = lin + ix                        # (E, TB)

    # ---- CrossNetwork + first MLP Linear (eval-mode BN folded), one MXU push.
    # x_i = x0 * s_i + t_i with batch-independent t_i, so only the scalars
    # p_i = w_i . x0 (rows 8i) and the pre-projected W1_bn @ x0 (rows 8L:8L+H)
    # are needed; the s recurrence runs on the otherwise-idle VPU.
    p = jnp.dot(slab_ref[PROJ_R0:PROJ_R0 + PROJ_ROWS, :], x0,
                preferred_element_type=jnp.float32)                # (8L+H, TB)
    s = 1.0 + p[0:1, :]                    # s_1 = 1*(1+p_0) + d_0, d_0 == w_0 . 0 == 0
    for i in range(1, L):
        s = s * (1.0 + p[8 * i:8 * i + 1, :]) + scal_ref[i]        # d_i from SMEM
    h = p[8 * L:8 * L + H, :] * s + slab_ref[B1_R0:B1_R0 + H, 0:1]  # (H, TB)
    h = jnp.maximum(h, 0.0)                # ReLU; Dropout = identity (eval)

    # ---- combine with FM branch and apply cd_linear (lane-dense (1, TB) store)
    x_out = x_fm + h                       # (H, TB)   (E == H)
    out_ref[...] = jnp.dot(slab_ref[WCD_R:WCD_R + 1, 0:H], x_out,
                           preferred_element_type=jnp.float32)      # (1, TB)


# ------------------------- host-side weight packing ---------------------------
def prepare_params(params):
    """One-time (per parameter set) packing of all weights into the slab + scalars."""
    field_of_v = np.repeat(np.arange(F), FIELD_DIMS)                # (N_VOCAB,)

    # gather table rows: [block-placed emb_main | emb_fm | emb_fm^2 | lin]
    main_t = params["emb_main"].T                                    # (E, V)
    main_block = jnp.concatenate(
        [main_t * jnp.asarray(field_of_v == f, jnp.float32)[None, :]
         for f in range(F)], axis=0)                                 # (D, V) block-placed
    gather_tbl = jnp.concatenate(
        [main_block,
         params["emb_fm"].T,                                         # (E, V)
         (params["emb_fm"] ** 2).T,                                  # (E, V)
         params["lin_fm"].T], axis=0)                                # (1, V)  -> (RG, V)

    # fold eval-mode BatchNorm into the first Linear
    scale = params["bn_g"] * jax.lax.rsqrt(params["bn_rv"] + BN_EPS)    # (1, H)
    w1_bn = (params["w1"] * scale).T                                    # (H, D)
    b1_eff = (params["b1"] - params["bn_rm"]) * scale + params["bn_b"]  # (1, H)

    # cross network:  x_i = x0 * s_i + t_i,  t_i = sum_{j<i} b_j (batch independent)
    b_cross = params["b_cross"]                                      # (L, D)
    t_prefix = jnp.cumsum(b_cross, axis=0) - b_cross                 # exclusive prefix = t_i
    d = jnp.sum(params["w_cross"] * t_prefix, axis=1)                # (L,)  d_i = w_i . t_i
    t_final = jnp.sum(b_cross, axis=0)                               # (D,)  t_L
    # final cross bias folded through the (BN-folded) first Linear
    b1_fold = w1_bn @ t_final[:, None] + b1_eff.T                    # (H, 1)

    # projection block: rows 8i = w_cross[i] (8-aligned), rows 8L:8L+H = W1_bn
    proj = jnp.zeros((PROJ_ROWS, D), jnp.float32)
    for i in range(L):
        proj = proj.at[8 * i].set(params["w_cross"][i])
    proj = proj.at[8 * L:8 * L + H].set(w1_bn)

    slab = jnp.zeros((SLAB_R, SLAB_C), jnp.float32)
    slab = slab.at[0:RG, 0:N_VOCAB].set(gather_tbl)
    slab = slab.at[PROJ_R0:PROJ_R0 + PROJ_ROWS, :].set(proj)
    slab = slab.at[B1_R0:B1_R0 + H, 0].set(b1_fold[:, 0])
    slab = slab.at[WCD_R, 0:H].set(params["w_cd"][:, 0])

    scal = jnp.concatenate(
        [d, params["lin_bias"].reshape(-1)]).astype(jnp.float32)     # [d_0..d_{L-1}, lin_bias]
    return {"slab": slab, "scal": scal,
            "offsets": jnp.asarray(params["offsets"], jnp.int32)}


# --------------------------------- wrapper ------------------------------------
@partial(jax.jit, static_argnames=("tb",))
def fm_dcn_forward(x_idx, prep, tb=None):
    """x_idx: (B, F) int32 per-field indices.  Returns (B,) f32 predictions."""
    batch = x_idx.shape[0]
    if tb is None:
        # Wide lane-dense tiles amortize the ~0.35us/step grid overhead; keep the
        # grid length >= 2 when the batch allows it so the "parallel" axis can be
        # sharded across v7x's two TensorCores (v5e/v6e just loop over 2 steps).
        if batch >= 512:
            tb = pl.cdiv(batch, 2 * 128) * 128
        else:
            tb = max(128, pl.cdiv(batch, 128) * 128)
    nb = pl.cdiv(batch, tb)
    bp = nb * tb

    # per-batch host work is just offset-add + transpose of the tiny index matrix
    idx_t = (x_idx.astype(jnp.int32) + prep["offsets"][None, :]).T   # (F, B)
    if bp != batch:
        idx_t = jnp.pad(idx_t, ((0, 0), (0, bp - batch)))

    out = pl.pallas_call(
        fm_dcn_kernel,
        out_shape=jax.ShapeDtypeStruct((1, bp), jnp.float32),
        grid=(nb,),
        in_specs=[
            pl.BlockSpec((F, tb), lambda i: (0, i)),                 # streamed indices
            pl.BlockSpec((SLAB_R, SLAB_C), lambda i: (0, 0)),        # VMEM-resident weight slab
            pl.BlockSpec(memory_space=pltpu.MemorySpace.SMEM),       # d_i scalars + lin bias
        ],
        out_specs=pl.BlockSpec((1, tb), lambda i: (0, i)),
        compiler_params=pltpu.CompilerParams(
            dimension_semantics=("parallel",)),
    )(idx_t, prep["slab"], prep["scal"])

    return out[0, :batch]                                            # p.squeeze(1)


# ------------------------ deterministic parameter init ------------------------
def init_params(key):
    n_vocab = int(np.sum(FIELD_DIMS))
    offsets = np.concatenate([[0], np.cumsum(FIELD_DIMS)[:-1]]).astype(np.int32)
    ks = jax.random.split(key, 9)

    def xavier(k, shape):
        bound = float(np.sqrt(6.0 / (shape[0] + shape[1])))
        return jax.random.uniform(k, shape, jnp.float32, -bound, bound)

    def lin_uniform(k, shape, fan_in):
        bound = 1.0 / float(np.sqrt(fan_in))
        return jax.random.uniform(k, shape, jnp.float32, -bound, bound)

    return {
        "offsets": offsets,
        # FM_DCN.embedding (FeaturesEmbedding, xavier_uniform)
        "emb_main": xavier(ks[0], (n_vocab, E)),
        # FactorizationMachineModel.embedding (separate table)
        "emb_fm": xavier(ks[1], (n_vocab, E)),
        # FeaturesLinear.fc (Embedding(n_vocab, 1)) + bias
        "lin_fm": jax.random.normal(ks[2], (n_vocab, 1), jnp.float32),
        # module inits these to zeros; randomized here to exercise the folded paths
        "lin_bias": 0.1 * jax.random.normal(ks[7], (1, 1), jnp.float32),
        # CrossNetwork: L linears (D -> 1, no bias) stacked + L bias vectors
        "w_cross": lin_uniform(ks[3], (L, D), D),
        "b_cross": 0.1 * jax.random.normal(ks[8], (L, D), jnp.float32),
        # MLP layer 0: Linear(D, H) (+ default-uniform bias), BatchNorm1d(H)
        "w1": lin_uniform(ks[4], (D, H), D),
        "b1": lin_uniform(ks[5], (1, H), D),
        "bn_g": jnp.ones((1, H), jnp.float32),
        "bn_b": jnp.zeros((1, H), jnp.float32),
        "bn_rm": jnp.zeros((1, H), jnp.float32),
        "bn_rv": jnp.ones((1, H), jnp.float32),
        # cd_linear: Linear(H, 1, bias=False)
        "w_cd": lin_uniform(ks[6], (H, 1), H),
    }


# --------------------------- pure-JAX reference --------------------------------
def fm_dcn_reference(x_idx, params):
    offsets = jnp.asarray(params["offsets"])
    idx = x_idx + offsets[None, :]
    emb_main = jnp.take(params["emb_main"], idx, axis=0)             # (B, F, E)
    embed_x = emb_main.reshape(x_idx.shape[0], D)
    emb_fm = jnp.take(params["emb_fm"], idx, axis=0)                 # (B, F, E)
    lin_fm = jnp.take(params["lin_fm"], idx, axis=0)[..., 0]         # (B, F)

    # FM model branch (reduce_sum=False) + FeaturesLinear
    x_fm = (jnp.sum(lin_fm, axis=1, keepdims=True) + params["lin_bias"][0, 0]
            + 0.5 * (jnp.sum(emb_fm, axis=1) ** 2 - jnp.sum(emb_fm ** 2, axis=1)))

    # Cross network
    x0 = embed_x
    x = x0
    for i in range(L):
        xw = x @ params["w_cross"][i][:, None]
        x = x0 * xw + params["b_cross"][i][None, :] + x

    # MLP (eval-mode BN, identity dropout)
    h = x @ params["w1"] + params["b1"]
    h = ((h - params["bn_rm"]) * jax.lax.rsqrt(params["bn_rv"] + BN_EPS)
         * params["bn_g"] + params["bn_b"])
    h = jnp.maximum(h, 0.0)

    x_out = x_fm + h
    return (x_out @ params["w_cd"])[:, 0]


# ----------------------------------- main --------------------------------------
if __name__ == "__main__":
    key = jax.random.PRNGKey(0)
    k_par, k_idx = jax.random.split(key)
    params = init_params(k_par)
    prep = prepare_params(params)

    # integer field indices, each column within its own field's vocabulary
    x_idx = jax.random.randint(
        k_idx, (B, F), 0, int(FIELD_DIMS[0]), dtype=jnp.int32)

    out = jax.block_until_ready(fm_dcn_forward(x_idx, prep))
    ref = jax.block_until_ready(fm_dcn_reference(x_idx, params))

    np.testing.assert_allclose(np.asarray(out), np.asarray(ref),
                               rtol=1e-4, atol=1e-4)
    assert out.shape == (B,)
    print("KERNEL_OK")
</pallas_src>

<mosaic_0001>
module attributes {stable_mosaic.version = 11 : i64} {
  func.func @fm_dcn_kernel(%arg0: i32, %arg1: memref<4x256xi32, #tpu.memory_space<vmem>>, %arg2: memref<160x64xf32, #tpu.memory_space<vmem>>, %arg3: memref<3xf32, #tpu.memory_space<smem>>, %arg4: memref<1x256xf32, #tpu.memory_space<vmem>>) attributes {dimension_semantics = [#tpu.dimension_semantics<parallel>], iteration_bounds = array<i64: 2>, scalar_prefetch = 0 : i64, scratch_operands = 0 : i64, tpu.core_type = #tpu.core_type<tc>, window_params = [{transform_indices = @transform_0, window_bounds = array<i64: 4, 256>}, {pipeline_mode = #tpu.pipeline_mode<synchronous>, transform_indices = @transform_1, window_bounds = array<i64: 160, 64>}, {transform_indices = @transform_2, window_bounds = array<i64: 3>}, {transform_indices = @transform_3, window_bounds = array<i64: 1, 256>}]} {
    %c0 = arith.constant 0 : index
    %c0_0 = arith.constant 0 : index
    %0 = vector.load %arg1[%c0, %c0_0] : memref<4x256xi32, #tpu.memory_space<vmem>>, vector<4x256xi32>
    %1 = tpu.iota {dimensions = array<i32: 0>} : vector<64x256xi32>
    %cst = arith.constant 0.000000e+00 : f32
    %2 = vector.broadcast %cst : f32 to vector<64x256xf32>
    %3 = vector.extract_strided_slice %0 {offsets = [0, 0], sizes = [1, 256], strides = [1, 1]} : vector<4x256xi32> to vector<1x256xi32>
    %4 = vector.broadcast %3 : vector<1x256xi32> to vector<64x256xi32>
    %5 = arith.cmpi eq, %1, %4 : vector<64x256xi32>
    %6 = arith.extui %5 : vector<64x256xi1> to vector<64x256xi32>
    %7 = arith.sitofp %6 : vector<64x256xi32> to vector<64x256xf32>
    %8 = arith.addf %2, %7 : vector<64x256xf32>
    %9 = vector.extract_strided_slice %0 {offsets = [1, 0], sizes = [1, 256], strides = [1, 1]} : vector<4x256xi32> to vector<1x256xi32>
    %10 = vector.broadcast %9 : vector<1x256xi32> to vector<64x256xi32>
    %11 = arith.cmpi eq, %1, %10 : vector<64x256xi32>
    %12 = arith.extui %11 : vector<64x256xi1> to vector<64x256xi32>
    %13 = arith.sitofp %12 : vector<64x256xi32> to vector<64x256xf32>
    %14 = arith.addf %8, %13 : vector<64x256xf32>
    %15 = vector.extract_strided_slice %0 {offsets = [2, 0], sizes = [1, 256], strides = [1, 1]} : vector<4x256xi32> to vector<1x256xi32>
    %16 = vector.broadcast %15 : vector<1x256xi32> to vector<64x256xi32>
    %17 = arith.cmpi eq, %1, %16 : vector<64x256xi32>
    %18 = arith.extui %17 : vector<64x256xi1> to vector<64x256xi32>
    %19 = arith.sitofp %18 : vector<64x256xi32> to vector<64x256xf32>
    %20 = arith.addf %14, %19 : vector<64x256xf32>
    %21 = vector.extract_strided_slice %0 {offsets = [3, 0], sizes = [1, 256], strides = [1, 1]} : vector<4x256xi32> to vector<1x256xi32>
    %22 = vector.broadcast %21 : vector<1x256xi32> to vector<64x256xi32>
    %23 = arith.cmpi eq, %1, %22 : vector<64x256xi32>
    %24 = arith.extui %23 : vector<64x256xi1> to vector<64x256xi32>
    %25 = arith.sitofp %24 : vector<64x256xi32> to vector<64x256xf32>
    %26 = arith.addf %20, %25 : vector<64x256xf32>
    %c0_1 = arith.constant 0 : index
    %c0_2 = arith.constant 0 : index
    %27 = vector.load %arg2[%c0_1, %c0_2] : memref<160x64xf32, #tpu.memory_space<vmem>>, vector<104x64xf32>
    %cst_3 = arith.constant dense<0.000000e+00> : vector<104x256xf32>
    %28 = tpu.matmul %27, %26, %cst_3 {dimension_numbers = #tpu.dot_dimension_numbers<[1], [0], [0], [1], [0, 0, 1, 1], [], []>} : vector<104x64xf32>, vector<64x256xf32>, vector<104x256xf32> -> vector<104x256xf32>
    %29 = vector.extract_strided_slice %28 {offsets = [0, 0], sizes = [64, 256], strides = [1, 1]} : vector<104x256xf32> to vector<64x256xf32>
    %30 = vector.extract_strided_slice %28 {offsets = [64, 0], sizes = [16, 256], strides = [1, 1]} : vector<104x256xf32> to vector<16x256xf32>
    %31 = vector.extract_strided_slice %28 {offsets = [80, 0], sizes = [16, 256], strides = [1, 1]} : vector<104x256xf32> to vector<16x256xf32>
    %32 = vector.extract_strided_slice %28 {offsets = [96, 0], sizes = [1, 256], strides = [1, 1]} : vector<104x256xf32> to vector<1x256xf32>
    %c2 = arith.constant 2 : index
    %33 = memref.load %arg3[%c2] : memref<3xf32, #tpu.memory_space<smem>>
    %34 = vector.broadcast %33 : f32 to vector<1x256xf32>
    %35 = arith.addf %32, %34 : vector<1x256xf32>
    %36 = arith.mulf %30, %30 : vector<16x256xf32>
    %37 = arith.subf %36, %31 : vector<16x256xf32>
    %cst_4 = arith.constant 5.000000e-01 : f32
    %38 = vector.broadcast %cst_4 : f32 to vector<16x256xf32>
    %39 = arith.mulf %38, %37 : vector<16x256xf32>
    %40 = vector.broadcast %35 : vector<1x256xf32> to vector<16x256xf32>
    %41 = arith.addf %40, %39 : vector<16x256xf32>
    %c104 = arith.constant 104 : index
    %c0_5 = arith.constant 0 : index
    %42 = vector.load %arg2[%c104, %c0_5] : memref<160x64xf32, #tpu.memory_space<vmem>>, vector<32x64xf32>
    %cst_6 = arith.constant dense<0.000000e+00> : vector<32x256xf32>
    %43 = tpu.matmul %42, %29, %cst_6 {dimension_numbers = #tpu.dot_dimension_numbers<[1], [0], [0], [1], [0, 0, 1, 1], [], []>} : vector<32x64xf32>, vector<64x256xf32>, vector<32x256xf32> -> vector<32x256xf32>
    %44 = vector.extract_strided_slice %43 {offsets = [0, 0], sizes = [1, 256], strides = [1, 1]} : vector<32x256xf32> to vector<1x256xf32>
    %cst_7 = arith.constant 1.000000e+00 : f32
    %45 = vector.broadcast %cst_7 : f32 to vector<1x256xf32>
    %46 = arith.addf %45, %44 : vector<1x256xf32>
    %47 = vector.extract_strided_slice %43 {offsets = [8, 0], sizes = [1, 256], strides = [1, 1]} : vector<32x256xf32> to vector<1x256xf32>
    %cst_8 = arith.constant 1.000000e+00 : f32
    %48 = vector.broadcast %cst_8 : f32 to vector<1x256xf32>
    %49 = arith.addf %48, %47 : vector<1x256xf32>
    %50 = arith.mulf %46, %49 : vector<1x256xf32>
    %c1 = arith.constant 1 : index
    %51 = memref.load %arg3[%c1] : memref<3xf32, #tpu.memory_space<smem>>
    %52 = vector.broadcast %51 : f32 to vector<1x256xf32>
    %53 = arith.addf %50, %52 : vector<1x256xf32>
    %54 = vector.extract_strided_slice %43 {offsets = [16, 0], sizes = [16, 256], strides = [1, 1]} : vector<32x256xf32> to vector<16x256xf32>
    %55 = vector.broadcast %53 : vector<1x256xf32> to vector<16x256xf32>
    %56 = arith.mulf %54, %55 : vector<16x256xf32>
    %c136 = arith.constant 136 : index
    %c0_9 = arith.constant 0 : index
    %57 = vector.load %arg2[%c136, %c0_9] : memref<160x64xf32, #tpu.memory_space<vmem>>, vector<16x1xf32>
    %58 = vector.broadcast %57 : vector<16x1xf32> to vector<16x256xf32>
    %59 = arith.addf %56, %58 : vector<16x256xf32>
    %cst_10 = arith.constant 0.000000e+00 : f32
    %60 = vector.broadcast %cst_10 : f32 to vector<16x256xf32>
    %61 = arith.maximumf %59, %60 : vector<16x256xf32>
    %62 = arith.addf %41, %61 : vector<16x256xf32>
    %c152 = arith.constant 152 : index
    %c0_11 = arith.constant 0 : index
    %63 = vector.load %arg2[%c152, %c0_11] : memref<160x64xf32, #tpu.memory_space<vmem>>, vector<1x16xf32>
    %cst_12 = arith.constant dense<0.000000e+00> : vector<1x256xf32>
    %64 = tpu.matmul %63, %62, %cst_12 {dimension_numbers = #tpu.dot_dimension_numbers<[1], [0], [0], [1], [0, 0, 1, 1], [], []>} : vector<1x16xf32>, vector<16x256xf32>, vector<1x256xf32> -> vector<1x256xf32>
    %c0_13 = arith.constant 0 : index
    %c0_14 = arith.constant 0 : index
    %65 = vector.load %arg4[%c0_13, %c0_14] : memref<1x256xf32, #tpu.memory_space<vmem>>, vector<1x256xf32>
    tpu.vector_store %arg4[%c0_13, %c0_14], %64 {strides = array<i32>} : memref<1x256xf32, #tpu.memory_space<vmem>>, vector<1x256xf32>,
    return
  }
  func.func @transform_0(%arg0: i32) -> (i32, i32) {
    %c0_i32 = arith.constant 0 : i32
    %c0_i32_0 = arith.constant 0 : i32
    return %c0_i32, %arg0 : i32, i32
  }
  func.func @transform_1(%arg0: i32) -> (i32, i32) {
    %c0_i32 = arith.constant 0 : i32
    %c0_i32_0 = arith.constant 0 : i32
    %c0_i32_1 = arith.constant 0 : i32
    return %c0_i32, %c0_i32_0 : i32, i32
  }
  func.func @transform_2(%arg0: i32) -> i32 {
    %c0_i32 = arith.constant 0 : i32
    %c0_i32_0 = arith.constant 0 : i32
    return %c0_i32 : i32
  }
  func.func @transform_3(%arg0: i32) -> (i32, i32) {
    %c0_i32 = arith.constant 0 : i32
    %c0_i32_0 = arith.constant 0 : i32
    return %c0_i32, %arg0 : i32, i32
  }
}

</mosaic_0001>

<bundles_post_ra>
// kernel: fm_dcn_forward.1
= control target key start
LH: loop header
LB: loop body
LE: loop exit
PB: predicated region body
PF: predicated region fallthrough
CT: control target
= control target key end

     0   :  { %8 = vsyncpa [#allocation4], 0  ;;  %s1791_s0 = inlined_call_operand.vmem [shape: s32[4,512], index: 0, kind: input, shape index: {}]   ;;  %s1792_s1 = inlined_call_operand.vmem [shape: f32[160,64], index: 1, kind: input, shape index: {}]   ;;  %s1793_s2 = inlined_call_operand.vmem [shape: f32[3], index: 2, kind: input, shape index: {}]   ;;  %s1794_s3 = inlined_call_operand.hbm [shape: f32[1,512], index: 3, kind: output, shape index: {}]  }
   0x1   :  { %9 = vsyncpa [#allocation3], 0 }
   0x2   :  { %11 = vsyncpa [#allocation3 + $0x1], 0  ;;  %s1351_s12 = smov 0   ;;  %s1353_s13 = smov 0  }
   0x3   :  { %s1355_s14 = smov 0   ;;  %s1357_s15 = smov 0  }
   0x4 LB: > { %s1372_s16 = sadd.s32 4294967295, %s1324_s15   ;;  %s1076_s17 = sadd.s32 4294967294, %s1324_s15   ;;  %s1324_s15 = sphi %s1357_s15, %s1801_s15   ;;  %s1320_s14 = sphi %s1355_s14, %s1800_s14   ;;  %s1316_s13 = sphi %s1353_s13, %s1799_s13   ;;  %s1312_s12 = sphi %s1351_s12, %s1798_s12  }
   0x5   : > { %s1376_s18 = sadd.s32 1, %s1324_s15   ;;  %s92_s19 = sadd.s32 1, %s1320_s14 }
   0x6   : > { %s89_s20 = ssub.s32 %s1324_s15, %s1376_s18  ;;  %p102_p0 = scmp.ne.s32.totalorder %s1320_s14, %s1316_s13 }
   0x7   : > { %p90_p1 = scmp.eq.s32.totalorder %s89_s20, 0  ;;  %p103_p2 = scmp.eq.s32.totalorder %s1372_s16, 1 }
   0x8   : > { %p108_p3 = scmp.ne.s32.totalorder %s1316_s13, %s1312_s12  ;;  %p109_p4 = scmp.eq.s32.totalorder %s1076_s17, 1 }
   0x9   : > { %s1387_s21 = scalar_select %p90_p1, %s1320_s14, %s92_s19  }
   0xa   : > { %p1389_p5 = por %p103_p2, %p102_p0  ;;  %p1393_p6 = por %p109_p4, %p108_p3 }
   0xb   : > { %p1077_p7 = scmp.ge.s32.totalorder %s1324_s15, 1  ;;  %p116_p8 = scmp.lt.s32.totalorder %s1324_s15, 3 }
   0xc   : > { %p1205_p9 = scmp.eq.s32.totalorder %s1372_s16, 0  ;;  %s132_s27 = sshll.u32 %s1793_s2, 4  ;;  %s133_s27 = int_to_ptr.vmem [resolvable:$true] %s132_s27 }
   0xd   : > { %p1400_p10 = pnand %p1077_p7, %p116_p8  ;;  %s1245_s28 = scalar_lea.vmem %s133_s27, 16 }
   0xe   : > { %p1246_p13 = scmp.ne.s32.totalorder %s133_s27, %s1245_s28  ;;  %p1253_p3 = scmp.lt.s32.totalorder %s133_s27, %s133_s27 }
   0xf   : > { %p1197_p11 = pneg %p1400_p10  ;;  %p1254_p4 = scmp.lt.s32.totalorder %s1245_s28, %s1245_s28 }
  0x11   : > { %p1198_p12 = pnand %p1205_p9, %p1197_p11  ;;  %p1255_p7 = por %p1254_p4, %p1253_p3 }
  0x13   : > { %p1247_p0 = pneg %p1198_p12 }
  0x15   : > { %p1248_p1 = pnand %p1247_p0, %p1246_p13 }
  0x17   : > { %p1249_p2 = pneg %p1248_p1 }
  0x19   : > { %p1256_p8 = pnand %p1255_p7, %p1249_p2 }
  0x1b   : > { %1259 = shalt.err (!%p1256_p8)
}
  0x1c   : > { %s1326_s29 = smov [#allocation2]   ;;  %154 = sbr.rel (%p1400_p10) target bundleno = 769 (0x301), region = 32 }
  0x1d   : > { %1200 = dma.vmem_to_smem (!%p1198_p12), %s133_s27, 16, %s1326_s29, [#allocation4]  }
  0x21   : > { %1303 = dma.done.wait (%p1205_p9), [#allocation4], 16  }
  0x22   : > { %1305 = vsyncadd (%p1205_p9), [#allocation4], 4294967280 }
  0x23   : > { %160 = sfence }
  0x24   : > { %s1083_s30 = sshll.u32 %s1372_s16, 1  ;;  %v187_v0 = vlaneseq  ;;  %v1327_v1 = vmov 0.0   ;;  %s1167_s10 = sld [smem:[#allocation2 + $0x1]] }
  0x25   : > { %p180_p11 = scmp.lt.s32.totalorder %s1083_s30, 3  ;;  %633 = vmatprep.mubr.f32.mxu0 %v1327_v1  ;;  %687 = vmatprep.mubr.f32.mxu1 %v1327_v1  ;;  %s1162_s11 = sld [smem:[#allocation2 + $0x2]] }
  0x26   : > { %v1421_v2 = vshrl.u32 %v187_v0, 7  ;;  %s176_s20 = sand.u32 1, %s1316_s13   ;;  %s1174_s25 = sshll.u32 %s1372_s16, 5 }
  0x27   : > { %s1803_s30 = smov (!%p180_p11, %s1083_s30), 3  ;;  %s1082_s24 = sshll.u32 %s176_s20, 1 }
  0x28   : > { %v1424_v3 = vsub.s32 0, %v1421_v2  ;;  %v202_v4 = vsub.s32 4, %v1421_v2  ;;  %v278_v5 = vsub.s32 1, %v1421_v2  ;;  %s1084_s4 = sshll.u32 %s1803_s30, 2  ;;  %v282_v6 = vsub.s32 5, %v1421_v2  ;;  %s178_s26 = scalar_lea.vmem [#allocation5], %s1082_s24 }
  0x29   : > { %v358_v7 = vsub.s32 2, %v1421_v2  ;;  %v362_v8 = vsub.s32 6, %v1421_v2  ;;  %v438_v9 = vsub.s32 3, %v1421_v2  ;;  %s183_s7 = scalar_lea.vmem %s1791_s0, %s1084_s4  ;;  %v195_v10 = vadd.s32 56, %v1421_v2  ;;  %s1005_s27 = sshll.u32 %s178_s26, 4  ;;  %s1006_s27 = int_to_ptr.vmem [resolvable:$true] %s1005_s27 }
  0x2a   : > { %v442_v11 = vsub.s32 7, %v1421_v2  ;;  %v1438_v12 = vadd.s32 48, %v1421_v2  ;;  %v1441_v13 = vadd.s32 40, %v1421_v2  ;;  %v186_v14 = vld [vmem:[%s183_s7] sm:$0xff]  ;;  %v1444_v15 = vadd.s32 32, %v1421_v2  ;;  %s1003_s30 = scalar_lea.hbm %s1794_s3, %s1174_s25  ;;  %s991_s4 = scalar_lea.sflag [#allocation3], %s176_s20 }
  0x2b   : > { %v1447_v16 = vadd.s32 24, %v1421_v2  ;;  %v1450_v17 = vadd.s32 16, %v1421_v2  ;;  %v1453_v18 = vadd.s32 8, %v1421_v2  ;;  %v203_v19 = vrot.slane %v186_v14, %v202_v4  ;;  %s1260_s5 = scalar_lea.vmem %s1006_s27, 32  ;;  %s1330_s6 = smov [#allocation5]  }
  0x2c   : > { %v283_v20 = vrot.slane %v186_v14, %v282_v6  ;;  %v363_v21 = vrot.slane %v186_v14, %v362_v8  ;;  %v443_v22 = vrot.slane %v186_v14, %v442_v11  ;;  %v199_v23 = vrot.slane %v186_v14, %v1424_v3  ;;  %p1261_p9 = scmp.ne.s32.totalorder %s1006_s27, %s1260_s5  ;;  %s1264_s16 = sshll.u32 %s1330_s6, 4  ;;  %s1265_s16 = int_to_ptr.vmem [resolvable:$false] %s1264_s16 }
  0x2d   : > { %v279_v24 = vrot.slane %v186_v14, %v278_v5  ;;  %v359_v25 = vrot.slane %v186_v14, %v358_v7  ;;  %v439_v26 = vrot.slane %v186_v14, %v438_v9  ;;  %v1457_v27 = vrot.slane %v203_v19, %v1424_v3  ;;  %s1266_s7 = scalar_lea.vmem %s1265_s16, 64  ;;  %p1267_p13 = scmp.lt.s32.totalorder %s1006_s27, %s1265_s16 }
  0x2e   : > { %v1459_v28 = vrot.slane %v283_v20, %v278_v5  ;;  %v1461_v29 = vrot.slane %v363_v21, %v358_v7  ;;  %v1463_v30 = vrot.slane %v443_v22, %v438_v9  ;;  %v1466_v31 = vrot.slane %v199_v23, %v1424_v3  ;;  %p1262_p10 = pnand %p1261_p9, %p1389_p5  ;;  %p1268_p0 = scmp.lt.s32.totalorder %s1266_s7, %s1260_s5 }
  0x2f   : > { %v1468_v32 = vrot.slane %v279_v24, %v278_v5  ;;  %v1470_v33 = vrot.slane %v359_v25, %v358_v7  ;;  %v1472_v34 = vrot.slane %v439_v26, %v438_v9  ;;  %vm227_vm0 = vcmp.eq.s32.totalorder %v195_v10, %v1457_v27 }
  0x30   : > { %vm307_vm1 = vcmp.eq.s32.totalorder %v195_v10, %v1459_v28  ;;  %vm387_vm2 = vcmp.eq.s32.totalorder %v195_v10, %v1461_v29  ;;  %vm467_vm3 = vcmp.eq.s32.totalorder %v195_v10, %v1463_v30  ;;  %v1100_v35 = vsel %vm227_vm0, 1.0, %v1327_v1  ;;  %p1263_p12 = pneg %p1262_p10  ;;  %p1269_p1 = por %p1268_p0, %p1267_p13 }
  0x31   : > { %v1116_v36 = vsel %vm307_vm1, 1.0, %v1327_v1  ;;  %v1132_v37 = vsel %vm387_vm2, 1.0, %v1327_v1  ;;  %v1148_v38 = vsel %vm467_vm3, 1.0, %v1327_v1  ;;  %vm226_vm4 = vcmp.eq.s32.totalorder %v195_v10, %v1466_v31 }
  0x32   : > { %v355_v39 = vadd.f32 %v1116_v36, %v1100_v35  ;;  %vm306_vm5 = vcmp.eq.s32.totalorder %v195_v10, %v1468_v32  ;;  %vm386_vm6 = vcmp.eq.s32.totalorder %v195_v10, %v1470_v33  ;;  %v1099_v40 = vsel %vm226_vm4, 1.0, %v1327_v1  ;;  %p1270_p2 = pnand %p1269_p1, %p1263_p12 }
  0x33   : > { %v1115_v41 = vsel %vm306_vm5, 1.0, %v1327_v1  ;;  %v1131_v42 = vsel %vm386_vm6, 1.0, %v1327_v1  ;;  %vm466_vm7 = vcmp.eq.s32.totalorder %v195_v10, %v1472_v34  ;;  %vm225_vm8 = vcmp.eq.s32.totalorder %v1438_v12, %v1457_v27 }
  0x34   : > { %v435_v43 = vadd.f32 %v1132_v37, %v355_v39  ;;  %v354_v44 = vadd.f32 %v1115_v41, %v1099_v40  ;;  %v1147_v45 = vsel %vm466_vm7, 1.0, %v1327_v1  ;;  %v1098_v46 = vsel %vm225_vm8, 1.0, %v1327_v1 }
  0x35   : > { %vm305_vm9 = vcmp.eq.s32.totalorder %v1438_v12, %v1459_v28  ;;  %vm385_vm10 = vcmp.eq.s32.totalorder %v1438_v12, %v1461_v29  ;;  %vm465_vm11 = vcmp.eq.s32.totalorder %v1438_v12, %v1463_v30  ;;  %vm224_vm12 = vcmp.eq.s32.totalorder %v1438_v12, %v1466_v31 }
  0x36   : > { %v515_v47 = vadd.f32 %v1148_v38, %v435_v43  ;;  %v434_v48 = vadd.f32 %v1131_v42, %v354_v44  ;;  %v1114_v49 = vsel %vm305_vm9, 1.0, %v1327_v1  ;;  %v1130_v50 = vsel %vm385_vm10, 1.0, %v1327_v1 }
  0x37   : > { %v353_v51 = vadd.f32 %v1114_v49, %v1098_v46  ;;  %v1146_v52 = vsel %vm465_vm11, 1.0, %v1327_v1  ;;  %vm304_vm13 = vcmp.eq.s32.totalorder %v1438_v12, %v1468_v32  ;;  %v1097_v54 = vsel %vm224_vm12, 1.0, %v1327_v1 }
  0x38   : > { %585 = vmatprep.subr.mxu0 %v515_v47  ;;  %v514_v53 = vadd.f32 %v1147_v45, %v434_v48  ;;  %v1113_v55 = vsel %vm304_vm13, 1.0, %v1327_v1  ;;  %vm384_vm14 = vcmp.eq.s32.totalorder %v1438_v12, %v1470_v33  ;;  %1175 = vmatprep.subr.mxu1 %v515_v47  ;;  %vm464_vm15 = vcmp.eq.s32.totalorder %v1438_v12, %v1472_v34 }
  0x39   : > { %v433_v56 = vadd.f32 %v1130_v50, %v353_v51  ;;  %v352_v57 = vadd.f32 %v1113_v55, %v1097_v54  ;;  %v1129_v58 = vsel %vm384_vm14, 1.0, %v1327_v1  ;;  %v1145_v59 = vsel %vm464_vm15, 1.0, %v1327_v1 }
  0x3a   : > { %586 = vmatpush1.msra.mxu0 %v514_v53  ;;  %vm223_vm0 = vcmp.eq.s32.totalorder %v1441_v13, %v1457_v27  ;;  %vm303_vm1 = vcmp.eq.s32.totalorder %v1441_v13, %v1459_v28  ;;  %vm383_vm2 = vcmp.eq.s32.totalorder %v1441_v13, %v1461_v29  ;;  %1183 = vmatpush1.msra.mxu1 %v514_v53 }
  0x3b   : > { %v513_v60 = vadd.f32 %v1146_v52, %v433_v56  ;;  %v432_v61 = vadd.f32 %v1129_v58, %v352_v57  ;;  %v1096_v62 = vsel %vm223_vm0, 1.0, %v1327_v1  ;;  %v1112_v63 = vsel %vm303_vm1, 1.0, %v1327_v1 }
  0x3c   : > { %v351_v4 = vadd.f32 %v1112_v63, %v1096_v62  ;;  %v1128_v5 = vsel %vm383_vm2, 1.0, %v1327_v1  ;;  %vm463_vm3 = vcmp.eq.s32.totalorder %v1441_v13, %v1463_v30  ;;  %vm222_vm4 = vcmp.eq.s32.totalorder %v1441_v13, %v1466_v31 }
  0x3d   : > { %587 = vmatprep.subr.mxu0 %v513_v60  ;;  %v512_v6 = vadd.f32 %v1145_v59, %v432_v61  ;;  %v1144_v7 = vsel %vm463_vm3, 1.0, %v1327_v1  ;;  %v1095_v8 = vsel %vm222_vm4, 1.0, %v1327_v1  ;;  %vm302_vm5 = vcmp.eq.s32.totalorder %v1441_v13, %v1468_v32  ;;  %1176 = vmatprep.subr.mxu1 %v513_v60 }
  0x3e   : > { %v431_v9 = vadd.f32 %v1128_v5, %v351_v4  ;;  %v1111_v10 = vsel %vm302_vm5, 1.0, %v1327_v1  ;;  %vm382_vm6 = vcmp.eq.s32.totalorder %v1441_v13, %v1470_v33  ;;  %vm462_vm7 = vcmp.eq.s32.totalorder %v1441_v13, %v1472_v34 }
  0x3f   : > { %588 = vmatpush1.msra.mxu0 %v512_v6  ;;  %v350_v11 = vadd.f32 %v1111_v10, %v1095_v8  ;;  %v1127_v12 = vsel %vm382_vm6, 1.0, %v1327_v1  ;;  %v1143_v14 = vsel %vm462_vm7, 1.0, %v1327_v1  ;;  %vm221_vm8 = vcmp.eq.s32.totalorder %v1444_v15, %v1457_v27  ;;  %1184 = vmatpush1.msra.mxu1 %v512_v6 }
  0x40   : > { %v511_v19 = vadd.f32 %v1144_v7, %v431_v9  ;;  %v1094_v20 = vsel %vm221_vm8, 1.0, %v1327_v1  ;;  %vm301_vm9 = vcmp.eq.s32.totalorder %v1444_v15, %v1459_v28  ;;  %vm381_vm10 = vcmp.eq.s32.totalorder %v1444_v15, %v1461_v29 }
  0x41   : > { %v430_v13 = vadd.f32 %v1127_v12, %v350_v11  ;;  %v1110_v21 = vsel %vm301_vm9, 1.0, %v1327_v1  ;;  %v1126_v22 = vsel %vm381_vm10, 1.0, %v1327_v1  ;;  %vm461_vm11 = vcmp.eq.s32.totalorder %v1444_v15, %v1463_v30 }
  0x42   : > { %589 = vmatprep.subr.mxu0 %v511_v19  ;;  %v349_v23 = vadd.f32 %v1110_v21, %v1094_v20  ;;  %v1142_v24 = vsel %vm461_vm11, 1.0, %v1327_v1  ;;  %vm220_vm12 = vcmp.eq.s32.totalorder %v1444_v15, %v1466_v31  ;;  %vm300_vm13 = vcmp.eq.s32.totalorder %v1444_v15, %v1468_v32  ;;  %1177 = vmatprep.subr.mxu1 %v511_v19 }
  0x43   : > { %v510_v25 = vadd.f32 %v1143_v14, %v430_v13  ;;  %v1093_v26 = vsel %vm220_vm12, 1.0, %v1327_v1  ;;  %v1109_v35 = vsel %vm300_vm13, 1.0, %v1327_v1  ;;  %vm380_vm14 = vcmp.eq.s32.totalorder %v1444_v15, %v1470_v33 }
  0x44   : > { %v429_v36 = vadd.f32 %v1126_v22, %v349_v23  ;;  %v348_v37 = vadd.f32 %v1109_v35, %v1093_v26  ;;  %v1125_v38 = vsel %vm380_vm14, 1.0, %v1327_v1  ;;  %vm460_vm15 = vcmp.eq.s32.totalorder %v1444_v15, %v1472_v34 }
  0x45   : > { %590 = vmatpush1.msra.mxu0 %v510_v25  ;;  %v1141_v39 = vsel %vm460_vm15, 1.0, %v1327_v1  ;;  %vm219_vm0 = vcmp.eq.s32.totalorder %v1447_v16, %v1457_v27  ;;  %vm299_vm1 = vcmp.eq.s32.totalorder %v1447_v16, %v1459_v28  ;;  %vm379_vm2 = vcmp.eq.s32.totalorder %v1447_v16, %v1461_v29  ;;  %1185 = vmatpush1.msra.mxu1 %v510_v25 }
  0x46   : > { %v509_v40 = vadd.f32 %v1142_v24, %v429_v36  ;;  %v428_v41 = vadd.f32 %v1125_v38, %v348_v37  ;;  %v1092_v42 = vsel %vm219_vm0, 1.0, %v1327_v1  ;;  %v1108_v43 = vsel %vm299_vm1, 1.0, %v1327_v1 }
  0x47   : > { %v347_v15 = vadd.f32 %v1108_v43, %v1092_v42  ;;  %v1124_v44 = vsel %vm379_vm2, 1.0, %v1327_v1  ;;  %vm459_vm3 = vcmp.eq.s32.totalorder %v1447_v16, %v1463_v30  ;;  %vm218_vm4 = vcmp.eq.s32.totalorder %v1447_v16, %v1466_v31  ;;  %v519_v42 = vld [vmem:[%s1792_s1 + $0x18] sm:$0xff]  ;;  %v520_v43 = vld [vmem:[%s1792_s1 + $0x20] sm:$0xff] }
  0x48   : > { %591 = vmatprep.subr.mxu0 %v509_v40  ;;  %v508_v45 = vadd.f32 %v1141_v39, %v428_v41  ;;  %v1140_v46 = vsel %vm459_vm3, 1.0, %v1327_v1  ;;  %v1091_v47 = vsel %vm218_vm4, 1.0, %v1327_v1  ;;  %vm298_vm5 = vcmp.eq.s32.totalorder %v1447_v16, %v1468_v32  ;;  %1178 = vmatprep.subr.mxu1 %v509_v40  ;;  %v516_v41 = vld [vmem:[%s1792_s1] sm:$0xff] }
  0x49   : > { %v427_v48 = vadd.f32 %v1124_v44, %v347_v15  ;;  %v1107_v49 = vsel %vm298_vm5, 1.0, %v1327_v1  ;;  %vm378_vm6 = vcmp.eq.s32.totalorder %v1447_v16, %v1470_v33  ;;  %vm458_vm7 = vcmp.eq.s32.totalorder %v1447_v16, %v1472_v34  ;;  %v521_v15 = vld [vmem:[%s1792_s1 + $0x28] sm:$0xff]  ;;  %v522_v44 = vld [vmem:[%s1792_s1 + $0x30] sm:$0xff] }
  0x4a   : > { %592 = vmatpush1.msra.mxu0 %v508_v45  ;;  %v346_v50 = vadd.f32 %v1107_v49, %v1091_v47  ;;  %v1123_v51 = vsel %vm378_vm6, 1.0, %v1327_v1  ;;  %v1139_v52 = vsel %vm458_vm7, 1.0, %v1327_v1  ;;  %vm217_vm8 = vcmp.eq.s32.totalorder %v1450_v17, %v1457_v27  ;;  %1186 = vmatpush1.msra.mxu1 %v508_v45  ;;  %v523_v45 = vld [vmem:[%s1792_s1 + $0x38] sm:$0xff]  ;;  %v526_v47 = vld [vmem:[%s1792_s1 + $0x50] sm:$0xff]  ;;  %v524_v49 = vld [vmem:[%s1792_s1 + $0x40] sm:$0xff] }
  0x4b   : > { %v507_v53 = vadd.f32 %v1140_v46, %v427_v48  ;;  %v1090_v54 = vsel %vm217_vm8, 1.0, %v1327_v1  ;;  %vm297_vm9 = vcmp.eq.s32.totalorder %v1450_v17, %v1459_v28  ;;  %vm377_vm10 = vcmp.eq.s32.totalorder %v1450_v17, %v1461_v29  ;;  %v525_v46 = vld [vmem:[%s1792_s1 + $0x48] sm:$0xff]  ;;  %v527_v48 = vld [vmem:[%s1792_s1 + $0x58] sm:$0xff] }
  0x4c   : > { %v426_v16 = vadd.f32 %v1123_v51, %v346_v50  ;;  %v1106_v55 = vsel %vm297_vm9, 1.0, %v1327_v1  ;;  %v1122_v56 = vsel %vm377_vm10, 1.0, %v1327_v1  ;;  %vm457_vm11 = vcmp.eq.s32.totalorder %v1450_v17, %v1463_v30  ;;  %v528_v50 = vld [vmem:[%s1792_s1 + $0x60] sm:$0xff]  ;;  %v868_v51 = vld [vmem:[%s1792_s1 + $0x90] sm:$0xff] }
  0x4d   : > { %593 = vmatprep.subr.mxu0 %v507_v53  ;;  %v345_v57 = vadd.f32 %v1106_v55, %v1090_v54  ;;  %v1138_v58 = vsel %vm457_vm11, 1.0, %v1327_v1  ;;  %vm216_vm12 = vcmp.eq.s32.totalorder %v1450_v17, %v1466_v31  ;;  %vm296_vm13 = vcmp.eq.s32.totalorder %v1450_v17, %v1468_v32  ;;  %1179 = vmatprep.subr.mxu1 %v507_v53  ;;  %v867_v53 = vld [vmem:[%s1792_s1 + $0x88] sm:$0xff] }
  0x4e   : > { %v506_v59 = vadd.f32 %v1139_v52, %v426_v16  ;;  %v1089_v60 = vsel %vm216_vm12, 1.0, %v1327_v1  ;;  %v1105_v61 = vsel %vm296_vm13, 1.0, %v1327_v1  ;;  %vm376_vm14 = vcmp.eq.s32.totalorder %v1450_v17, %v1470_v33 }
  0x4f   : > { %v425_v62 = vadd.f32 %v1122_v56, %v345_v57  ;;  %v344_v63 = vadd.f32 %v1105_v61, %v1089_v60  ;;  %v1121_v4 = vsel %vm376_vm14, 1.0, %v1327_v1  ;;  %vm456_vm15 = vcmp.eq.s32.totalorder %v1450_v17, %v1472_v34 }
  0x50   : > { %594 = vmatpush1.msra.mxu0 %v506_v59  ;;  %v1137_v5 = vsel %vm456_vm15, 1.0, %v1327_v1  ;;  %vm215_vm0 = vcmp.eq.s32.totalorder %v1453_v18, %v1457_v27  ;;  %vm295_vm1 = vcmp.eq.s32.totalorder %v1453_v18, %v1459_v28  ;;  %vm375_vm2 = vcmp.eq.s32.totalorder %v1453_v18, %v1461_v29  ;;  %1187 = vmatpush1.msra.mxu1 %v506_v59 }
  0x51   : > { %v505_v6 = vadd.f32 %v1138_v58, %v425_v62  ;;  %v424_v7 = vadd.f32 %v1121_v4, %v344_v63  ;;  %v1088_v8 = vsel %vm215_vm0, 1.0, %v1327_v1  ;;  %v1104_v9 = vsel %vm295_vm1, 1.0, %v1327_v1 }
  0x52   : > { %v343_v17 = vadd.f32 %v1104_v9, %v1088_v8  ;;  %v1120_v10 = vsel %vm375_vm2, 1.0, %v1327_v1  ;;  %vm455_vm3 = vcmp.eq.s32.totalorder %v1453_v18, %v1463_v30  ;;  %vm214_vm4 = vcmp.eq.s32.totalorder %v1453_v18, %v1466_v31  ;;  %v740_v9 = vld [vmem:[%s1792_s1 + $0x68] sm:$0xff] }
  0x53   : > { %595 = vmatprep.subr.mxu0 %v505_v6  ;;  %v504_v11 = vadd.f32 %v1137_v5, %v424_v7  ;;  %v1136_v12 = vsel %vm455_vm3, 1.0, %v1327_v1  ;;  %v1087_v14 = vsel %vm214_vm4, 1.0, %v1327_v1  ;;  %vm294_vm5 = vcmp.eq.s32.totalorder %v1453_v18, %v1468_v32  ;;  %1180 = vmatprep.subr.mxu1 %v505_v6 }
  0x54   : > { %v423_v19 = vadd.f32 %v1120_v10, %v343_v17  ;;  %v1103_v20 = vsel %vm294_vm5, 1.0, %v1327_v1  ;;  %vm374_vm6 = vcmp.eq.s32.totalorder %v1453_v18, %v1470_v33  ;;  %vm454_vm7 = vcmp.eq.s32.totalorder %v1453_v18, %v1472_v34  ;;  %v741_v17 = vld [vmem:[%s1792_s1 + $0x70] sm:$0xff]  ;;  %v742_v10 = vld [vmem:[%s1792_s1 + $0x78] sm:$0xff] }
  0x55   : > { %596 = vmatpush1.msra.mxu0 %v504_v11  ;;  %v342_v13 = vadd.f32 %v1103_v20, %v1087_v14  ;;  %v1119_v21 = vsel %vm374_vm6, 1.0, %v1327_v1  ;;  %v1135_v22 = vsel %vm454_vm7, 1.0, %v1327_v1  ;;  %vm213_vm8 = vcmp.eq.s32.totalorder %v1421_v2, %v1457_v27  ;;  %1188 = vmatpush1.msra.mxu1 %v504_v11  ;;  %v743_v11 = vld [vmem:[%s1792_s1 + $0x80] sm:$0xff] }
  0x56   : > { %v503_v23 = vadd.f32 %v1136_v12, %v423_v19  ;;  %v1086_v24 = vsel %vm213_vm8, 1.0, %v1327_v1  ;;  %vm293_vm9 = vcmp.eq.s32.totalorder %v1421_v2, %v1459_v28  ;;  %vm373_vm10 = vcmp.eq.s32.totalorder %v1421_v2, %v1461_v29 }
  0x57   : > { %v422_v18 = vadd.f32 %v1119_v21, %v342_v13  ;;  %v1102_v25 = vsel %vm293_vm9, 1.0, %v1327_v1  ;;  %v1118_v26 = vsel %vm373_vm10, 1.0, %v1327_v1  ;;  %vm453_vm11 = vcmp.eq.s32.totalorder %v1421_v2, %v1463_v30 }
  0x58   : > { %597 = vmatprep.subr.mxu0 %v503_v23  ;;  %v341_v27 = vadd.f32 %v1102_v25, %v1086_v24  ;;  %v1134_v35 = vsel %vm453_vm11, 1.0, %v1327_v1  ;;  %vm212_vm12 = vcmp.eq.s32.totalorder %v1421_v2, %v1466_v31  ;;  %vm292_vm13 = vcmp.eq.s32.totalorder %v1421_v2, %v1468_v32  ;;  %1181 = vmatprep.subr.mxu1 %v503_v23 }
  0x59   : > { %v502_v28 = vadd.f32 %v1135_v22, %v422_v18  ;;  %v1085_v29 = vsel %vm212_vm12, 1.0, %v1327_v1  ;;  %v1101_v36 = vsel %vm292_vm13, 1.0, %v1327_v1  ;;  %vm372_vm14 = vcmp.eq.s32.totalorder %v1421_v2, %v1470_v33  ;;  %v517_v33 = vld [vmem:[%s1792_s1 + $0x8] sm:$0xff] }
  0x5a   : > { %v421_v30 = vadd.f32 %v1118_v26, %v341_v27  ;;  %v340_v37 = vadd.f32 %v1101_v36, %v1085_v29  ;;  %v1117_v38 = vsel %vm372_vm14, 1.0, %v1327_v1  ;;  %vm452_vm15 = vcmp.eq.s32.totalorder %v1421_v2, %v1472_v34  ;;  %v518_v34 = vld [vmem:[%s1792_s1 + $0x10] sm:$0xff] }
  0x5b   : > { %598 = vmatpush1.msra.mxu0 %v502_v28  ;;  %v1133_v31 = vsel %vm452_vm15, 1.0, %v1327_v1  ;;  %1189 = vmatpush1.msra.mxu1 %v502_v28  ;;  %vm529_vm0 = vcmask 523264   ;;  %v1328_v52 = vmov 0   ;;  %vm892_vm1 = vcmask 130048  }
  0x5c   : > { %v501_v32 = vadd.f32 %v1134_v35, %v421_v30  ;;  %v420_v39 = vadd.f32 %v1117_v38, %v340_v37  ;;  %1244 = vset.pattern.permute.xlu0 %v1328_v52  ;;  %vm987_vm2 = vcmp.lt.s32.totalorder %v187_v0, 256 }
  0x5d   : > { %876 = vperm.xlu0 %1244, %v868_v51  }
  0x5e   : > { %599 = vmatprep.subr.mxu0 %v501_v32  ;;  %v500_v40 = vadd.f32 %v1133_v31, %v420_v39  ;;  %1182 = vmatprep.subr.mxu1 %v501_v32  ;;  %v713_v39 = vstv %s1162_s11 }
  0x60   : > { %600 = vmatpush1.msra.mxu0 %v500_v40  ;;  %1190 = vmatpush1.msra.mxu1 %v500_v40 }
  0x61   : > { %1149 = vmatmul.mubr.msk.f32.vlgmr.msra.gmra.mxu0 %vm529_vm0, %v516_v41  ;;  %1158 = vmatmul.mubr.msk.f32.vlgmr.msra.gmra.mxu1 %vm529_vm0, %v525_v46 }
  0x62   : > { %639 = vmatprep.mubr.f32.mxu0 %v1327_v1  ;;  %693 = vmatprep.mubr.f32.mxu1 %v1327_v1 }
  0x63   : > { %871 = vperm.xlu0 %1244, %v867_v53  }
  0x65   : > { %1150 = vmatmul.mubr.msk.f32.gmra.mxu0 %vm529_vm0, %v517_v33  ;;  %1159 = vmatmul.mubr.msk.f32.gmra.mxu1 %vm529_vm0, %v526_v47 }
  0x66   : > { %645 = vmatprep.mubr.f32.mxu0 %v1327_v1  ;;  %699 = vmatprep.mubr.f32.mxu1 %v1327_v1 }
  0x69   : > { %1151 = vmatmul.mubr.msk.f32.gmra.mxu0 %vm529_vm0, %v518_v34  ;;  %1160 = vmatmul.mubr.msk.f32.gmra.mxu1 %vm529_vm0, %v527_v48 }
  0x6a   : > { %651 = vmatprep.mubr.f32.mxu0 %v1327_v1  ;;  %705 = vmatprep.mubr.f32.mxu1 %v1327_v1 }
  0x6d   : > { %1152 = vmatmul.mubr.msk.f32.gmra.mxu0 %vm529_vm0, %v519_v42  ;;  %1161 = vmatmul.mubr.msk.f32.gmra.mxu1 %vm529_vm0, %v528_v50 }
  0x6e   : > { %657 = vmatprep.mubr.f32.mxu0 %v1327_v1  ;;  %820 = vmatprep.mubr.f32.mxu1 %v1327_v1 }
  0x71   : > { %1153 = vmatmul.mubr.msk.f32.gmra.mxu0 %vm529_vm0, %v520_v43 }
  0x72   : > { %663 = vmatprep.mubr.f32.mxu0 %v1327_v1 }
  0x75   : > { %1154 = vmatmul.mubr.msk.f32.gmra.mxu0 %vm529_vm0, %v521_v15 }
  0x76   : > { %669 = vmatprep.mubr.f32.mxu0 %v1327_v1 }
  0x79   : > { %1155 = vmatmul.mubr.msk.f32.gmra.mxu0 %vm529_vm0, %v522_v44 }
  0x7a   : > { %675 = vmatprep.mubr.f32.mxu0 %v1327_v1 }
  0x7d   : > { %1156 = vmatmul.mubr.msk.f32.gmra.mxu0 %vm529_vm0, %v523_v45 }
  0x7e   : > { %681 = vmatprep.mubr.f32.mxu0 %v1327_v1 }
  0x81   : > { %1157 = vmatmul.mubr.msk.f32.gmra.mxu0 %vm529_vm0, %v524_v49 }
  0xd8   : > { %v877_v31 = vpop.permute.xlu0 %876 }
 0x121   : > { %v635_v54 = vpop.f32.mrf.mxu0  ;;  %v689_v12 = vpop.f32.mrf.mxu1 }
 0x122   : > { %v718_v32 = vmul.f32 %v689_v12, %v689_v12 }
 0x123   : > { %v637_v16 = vpop.f32.mrf.mxu0  ;;  %v691_v14 = vpop.f32.mrf.mxu1 }
 0x124   : > { %v719_v28 = vmul.f32 %v691_v14, %v691_v14 }
 0x125   : > { %v641_v55 = vpop.f32.mrf.mxu0  ;;  %v695_v19 = vpop.f32.mrf.mxu1 }
 0x127   : > { %v643_v56 = vpop.f32.mrf.mxu0  ;;  %v697_v20 = vpop.f32.mrf.mxu1 }
 0x129   : > { %v647_v57 = vpop.f32.mrf.mxu0  ;;  %v701_v13 = vpop.f32.mrf.mxu1 }
 0x12a   : > { %v722_v47 = vsub.f32 %v718_v32, %v701_v13 }
 0x12b   : > { %v649_v58 = vpop.f32.mrf.mxu0  ;;  %v703_v21 = vpop.f32.mrf.mxu1 }
 0x12c   : > { %v723_v42 = vsub.f32 %v719_v28, %v703_v21 }
 0x12d   : > { %v653_v59 = vpop.f32.mrf.mxu0  ;;  %v707_v22 = vpop.f32.mrf.mxu1 }
 0x12e   : > { %v714_v48 = vadd.f32 %v713_v39, %v707_v22 }
 0x12f   : > { %v655_v60 = vpop.f32.mrf.mxu0  ;;  %v709_v23 = vpop.f32.mrf.mxu1 }
 0x130   : > { %v715_v44 = vadd.f32 %v713_v39, %v709_v23  ;;  %v1329_v23 = vmov 1966171168  }
 0x131   : > { %v659_v61 = vpop.f32.mrf.mxu0 }
 0x133   : > { %v661_v62 = vpop.f32.mrf.mxu0 }
 0x135   : > { %v665_v63 = vpop.f32.mrf.mxu0 }
 0x137   : > { %v667_v4 = vpop.f32.mrf.mxu0 }
 0x139   : > { %v671_v5 = vpop.f32.mrf.mxu0 }
 0x13b   : > { %v673_v6 = vpop.f32.mrf.mxu0 }
 0x13d   : > { %v677_v7 = vpop.f32.mrf.mxu0 }
 0x13f   : > { %v679_v8 = vpop.f32.mrf.mxu0 }
 0x140   : > { %772 = vmatprep.subr.mxu1 %v679_v8 }
 0x141   : > { %773 = vmatpush1.msra.mxu1 %v677_v7  ;;  %v683_v18 = vpop.f32.mrf.mxu0 }
 0x142   : > { %774 = vmatprep.subr.mxu1 %v673_v6  ;;  %v716_v43 = vmul.f32 %v683_v18, %v683_v18 }
 0x143   : > { %775 = vmatpush1.msra.mxu1 %v671_v5  ;;  %v685_v29 = vpop.f32.mrf.mxu0 }
 0x144   : > { %776 = vmatprep.subr.mxu1 %v667_v4  ;;  %v717_v41 = vmul.f32 %v685_v29, %v685_v29 }
 0x145   : > { %777 = vmatpush1.msra.mxu1 %v665_v63 }
 0x146   : > { %778 = vmatprep.subr.mxu1 %v661_v62  ;;  %v721_v50 = vsub.f32 %v717_v41, %v697_v20  ;;  %v731_v62 = vrot.slane %v714_v48, %v1424_v3 }
 0x147   : > { %779 = vmatpush1.msra.mxu1 %v659_v61  ;;  %v726_v61 = vmul.f32 0.5, %v722_v47 }
 0x148   : > { %780 = vmatprep.subr.mxu1 %v655_v60  ;;  %v725_v4 = vmul.f32 0.5, %v721_v50 }
 0x149   : > { %781 = vmatpush1.msra.mxu1 %v653_v59 }
 0x14a   : > { %782 = vmatprep.subr.mxu1 %v649_v58 }
 0x14b   : > { %783 = vmatpush1.msra.mxu1 %v647_v57  ;;  %v735_v57 = vrot.slane %v715_v44, %v1424_v3 }
 0x14c   : > { %784 = vmatprep.subr.mxu1 %v643_v56 }
 0x14d   : > { %785 = vmatpush1.msra.mxu1 %v641_v55  ;;  %v720_v55 = vsub.f32 %v716_v43, %v695_v19  ;;  %v737_v14 = vadd.f32 %v735_v57, %v725_v4 }
 0x14e   : > { %786 = vmatprep.subr.mxu1 %v637_v16  ;;  %v727_v16 = vmul.f32 0.5, %v723_v42 }
 0x14f   : > { %787 = vmatpush1.msra.mxu1 %v635_v54  ;;  %v872_v54 = vpop.permute.xlu0 %871  ;;  %v724_v7 = vmul.f32 0.5, %v720_v55 }
 0x150   : > { %1163 = vmatmul.mubr.msk.f32.vlgmr.msra.gmra.mxu1 %vm529_vm0, %v740_v9  ;;  %v739_v9 = vadd.f32 %v735_v57, %v727_v16 }
 0x151   : > { %826 = vmatprep.mubr.f32.mxu1 %v1327_v1  ;;  %v736_v20 = vadd.f32 %v731_v62, %v724_v7 }
 0x154   : > { %1164 = vmatmul.mubr.msk.f32.gmra.mxu1 %vm529_vm0, %v741_v17 }
 0x155   : > { %832 = vmatprep.mubr.f32.mxu1 %v1327_v1 }
 0x158   : > { %1165 = vmatmul.mubr.msk.f32.gmra.mxu1 %vm529_vm0, %v742_v10 }
 0x159   : > { %838 = vmatprep.mubr.f32.mxu1 %v1327_v1 }
 0x15c   : > { %1166 = vmatmul.mubr.msk.f32.gmra.mxu1 %vm529_vm0, %v743_v11  ;;  %v738_v11 = vadd.f32 %v731_v62, %v726_v61 }
 0x15d   : > { %960 = vmatprep.mubr.f32.mxu1 %v1327_v1  ;;  %v852_v1 = vstv %s1167_s10 }
 0x210   : > { %v822_v24 = vpop.f32.mrf.mxu1 }
 0x211   : > { %v845_v27 = vadd.f32 1.0, %v822_v24  ;;  %v971_v24 = vunpack.c.l.s4 %v1329_v23 }
 0x212   : > { %v824_v25 = vpop.f32.mrf.mxu1 }
 0x213   : > { %v846_v30 = vadd.f32 1.0, %v824_v25  ;;  %v972_v18 = vunpack.c.0.s8 %v971_v24 }
 0x214   : > { %v828_v26 = vpop.f32.mrf.mxu1 }
 0x215   : > { %v847_v35 = vadd.f32 1.0, %v828_v26  ;;  %v975_v26 = vsub.s32 %v972_v18, %v1421_v2 }
 0x216   : > { %v830_v36 = vpop.f32.mrf.mxu1 }
 0x217   : > { %v849_v37 = vmul.f32 %v847_v35, %v845_v27  ;;  %v848_v38 = vadd.f32 1.0, %v830_v36 }
 0x218   : > { %v834_v40 = vpop.f32.mrf.mxu1 }
 0x219   : > { %v850_v33 = vmul.f32 %v848_v38, %v846_v30  ;;  %v853_v34 = vadd.f32 %v852_v1, %v849_v37 }
 0x21a   : > { %v836_v15 = vpop.f32.mrf.mxu1 }
 0x21b   : > { %v858_v45 = vrot.slane %v853_v34, %v1424_v3  ;;  %v854_v46 = vadd.f32 %v852_v1, %v850_v33 }
 0x21c   : > { %v840_v49 = vpop.f32.mrf.mxu1 }
 0x21d   : > { %v863_v51 = vmul.f32 %v858_v45, %v834_v40  ;;  %v862_v52 = vrot.slane %v854_v46, %v1424_v3  ;;  %v865_v53 = vmul.f32 %v858_v45, %v840_v49  ;;  %v891_v3 = vld [vmem:[%s1792_s1 + $0x98] sm:$0x1] }
 0x21e   : > { %v842_v56 = vpop.f32.mrf.mxu1 }
 0x21f   : > { %v864_v58 = vmul.f32 %v862_v52, %v836_v15  ;;  %v881_v59 = vadd.f32 %v877_v31, %v865_v53  ;;  %v866_v60 = vmul.f32 %v862_v52, %v842_v56  ;;  %v879_v63 = vadd.f32 %v872_v54, %v863_v51 }
 0x221   : > { %v880_v5 = vadd.f32 %v872_v54, %v864_v58  ;;  %v882_v6 = vadd.f32 %v877_v31, %v866_v60  ;;  %v885_v8 = vmax.f32 %v881_v59, 0.0  ;;  %v883_v12 = vmax.f32 %v879_v63, 0.0 }
 0x223   : > { %v884_v17 = vmax.f32 %v880_v5, 0.0  ;;  %v886_v10 = vmax.f32 %v882_v6, 0.0  ;;  %v889_v13 = vadd.f32 %v885_v8, %v738_v11  ;;  %v887_v22 = vadd.f32 %v883_v12, %v736_v20 }
 0x225   : > { %v890_v19 = vadd.f32 %v886_v10, %v739_v9  ;;  %v888_v21 = vadd.f32 %v884_v17, %v737_v14 }
 0x227   : > { %924 = vmatprep.subr.mxu1 %v890_v19 }
 0x228   : > { %925 = vmatpush1.msra.mxu1 %v889_v13 }
 0x229   : > { %926 = vmatprep.subr.mxu1 %v888_v21 }
 0x22a   : > { %927 = vmatpush1.msra.mxu1 %v887_v22 }
 0x22b   : > { %1168 = vmatmul.mubr.msk.f32.vlgmr.msra.gmra.mxu1 %vm892_vm1, %v891_v3 }
 0x2eb   : > { %v962_v25 = vpop.f32.mrf.mxu1 }
 0x2ed   : > { %v964_v27 = vpop.f32.mrf.mxu1 }
 0x2ee   : > { %v969_v35 = vcombine.low %v962_v25, %v964_v27 }
 0x2f0   : > { %v976_v28 = vrot.slane %v969_v35, %v975_v26 }
 0x2f2   : > { %v983_v29 = vrot.slane %v976_v28, %v975_v26 }
 0x2f4   : > { %989 = vst.msk [vmem:[%s178_s26] sm:$0x3] %vm987_vm2, %v983_v29 }
 0x2f5   : > { %1273 = shalt.err (!%p1270_p2)
}
 0x2f6   : > { %s1274_s8 = scalar_lea.hbm %s1003_s30, 32  ;;  %s1278_s11 = scalar_lea.hbm %s1794_s3, 64 }
 0x2f7   : > { %p1275_p3 = scmp.ne.s32.totalorder %s1003_s30, %s1274_s8  ;;  %p1279_p8 = scmp.lt.s32.totalorder %s1003_s30, %s1794_s3 }
 0x2f8   : > { %p1280_p11 = scmp.lt.s32.totalorder %s1278_s11, %s1274_s8 }
 0x2f9   : > { %p1276_p4 = pnand %p1275_p3, %p1389_p5 }
 0x2fa   : > { %p1281_p9 = por %p1280_p11, %p1279_p8 }
 0x2fb   : > { %p1277_p7 = pneg %p1276_p4 }
 0x2fd   : > { %p1282_p10 = pnand %p1281_p9, %p1277_p7 }
 0x2ff   : > { %1285 = shalt.err (!%p1282_p10)
}
 0x300   : > { %1195 = dma.vmem_to_hbm [thread:$0]  (%p1389_p5), %s1006_s27, 32, %s1003_s30, %s991_s4  }
 0x301 PF: > { %p1207_p12 = scmp.ge.s32.totalorder %s1324_s15, 2  ;;  %s1017_s20 = sand.u32 1, %s1312_s12  }
 0x302   : > { %s1018_s24 = scalar_lea.sflag [#allocation3], %s1017_s20 }
 0x303   : > { %p1202_p13 = pnand %p1207_p12, %p1393_p6 }
 0x305   : > { %p1203_p0 = pneg %p1202_p13 }
 0x307   : > { %1307 = dma.done.wait (%p1203_p0), %s1018_s24, 32  }
 0x308   : > { %1309 = vsyncadd (%p1203_p0), %s1018_s24, 4294967264  ;;  %p14_p1 = scmp.ge.s32.totalorder %s1376_s18, 4   ;;  %s1798_s12 = smov %s1316_s13 }
 0x309   : > { %s1799_s13 = smov %s1320_s14  ;;  %s1800_s14 = smov %s1387_s21 }
 0x30a   : > { %s1801_s15 = smov %s1376_s18  ;;  %16 = sbr.rel (!%p14_p1) target bundleno = 4 (0x4), region = 72 }
 0x30f   :  { %1023 = vsyncpa [#allocation3], 1 }
 0x310   :  { %1025 = vsyncpa [#allocation3 + $0x1], 1 }
 0x311   :  { %1026 = vsyncpa [#allocation4], 1 }
 0x312   :  { %1028 = vsyncpa [#allocation4 + $0x1], 1 }

</bundles_post_ra>
